<compile_context>
chip_gen: v7x
topology: tpu7x:2x2x1
jax: 0.10.0
libtpu: 0.0.40
codegen_flags: <defaults>
</compile_context>

<pallas_src>
import functools
import math

import jax
import jax.numpy as jnp
from jax.experimental import pallas as pl
from jax.experimental.pallas import tpu as pltpu


def _round_up(x, m):
    return ((x + m - 1) // m) * m


def _pad2d(x, shape, dtype):
    """Cast to `dtype` and zero-pad a 2-D array up to `shape`."""
    x = x.astype(dtype)
    if x.shape == tuple(shape):
        return x
    buf = jnp.zeros(shape, dtype)
    return buf.at[: x.shape[0], : x.shape[1]].set(x)


def _vmem_capacity_bytes():
    """Best-effort VMEM capacity query; conservative (v7x = 64 MiB) fallback."""
    try:
        return int(pltpu.get_tpu_info().vmem_capacity_bytes)
    except Exception:
        return 64 * 1024 * 1024


def _timestep_embedder_kernel(t_ref, freqs_ref, w1_ref, b1_ref, w2_ref, b2_ref,
                              out_ref, h_ref):
    # Grid = (batch tiles [parallel], W2 column tiles [arbitrary]).
    # t_ref:     (TN, 1)          f32   batch tile of timesteps
    # freqs_ref: (1, half)        f32   sinusoid frequencies   (resident)
    # w1_ref:    (F, Hpad)        bf16  first linear weight    (resident)
    # b1_ref:    (1, Hpad)        f32                          (resident)
    # w2_ref:    (Hpad, TILE_H)   bf16  W2 column tile (whole W2 when resident)
    # b2_ref:    (1, TILE_H)      f32
    # out_ref:   (TN, TILE_H)     f32/bf16
    # h_ref:     (TN, Hpad)       f32   VMEM scratch: SiLU(emb @ W1 + b1)
    j = pl.program_id(1)

    # Compute the hidden activation once per batch tile (j == 0), reuse for all
    # W2 column tiles of that batch tile.
    @pl.when(j == 0)
    def _():
        t = t_ref[...]                                    # (TN, 1)
        freqs = freqs_ref[...]                            # (1, half)
        args = t * freqs                                  # (TN, half) broadcast
        # Fused sinusoid embedding: lane-dim concat -> one K=2*half dot (full MXU
        # depth on v6e/v7x); bf16 MXU inputs, f32 accumulation.
        emb = jnp.concatenate([jnp.cos(args), jnp.sin(args)],
                              axis=-1).astype(jnp.bfloat16)          # (TN, F)
        h = jnp.dot(emb, w1_ref[...],
                    preferred_element_type=jnp.float32) + b1_ref[...]  # (TN, Hpad)
        h_ref[...] = h * jax.nn.sigmoid(h)                # SiLU, stored in f32

    # Second linear for this output-column tile.
    out = jnp.dot(h_ref[...].astype(jnp.bfloat16), w2_ref[...],
                  preferred_element_type=jnp.float32) + b2_ref[...]
    out_ref[...] = out.astype(out_ref.dtype)


def timestep_embedder(t, params, frequency_embedding_size=256, max_period=10000,
                      out_dtype=jnp.float32):
    """t: (N,) float array of timesteps. Returns (N, hidden_size) in out_dtype."""
    w1, b1, w2, b2 = params["w1"], params["b1"], params["w2"], params["b2"]
    F = frequency_embedding_size
    assert F % 2 == 0, "frequency_embedding_size must be even"
    # TODO(synk): odd-`dim` zero-pad branch of timestep_embedding not implemented
    # (F=256 is even, matching the module default).
    half = F // 2
    H = w1.shape[1]
    N = t.shape[0]

    # --- Tiling / residency decisions (generation-aware) -------------------------
    vmem_cap = _vmem_capacity_bytes()
    if vmem_cap >= 100 * 1024 * 1024:          # v5e / v6e (128 MiB physical)
        resident_budget = 24 * 1024 * 1024
        vmem_limit = 64 * 1024 * 1024
    else:                                      # v7x (64 MiB physical)
        resident_budget = 16 * 1024 * 1024
        vmem_limit = 48 * 1024 * 1024

    # bf16 sublane packing: 16 rows per vreg -> TN multiple of 16.
    TN = min(_round_up(max(N, 16), 16), 128)
    Npad = _round_up(N, TN)
    n_tiles = Npad // TN

    Hpad = _round_up(max(H, 128), 128)         # lane-dense hidden dim
    w2_bytes = Hpad * Hpad * 2                 # bf16
    if w2_bytes <= resident_budget:
        # Fast path: whole W2 resident in VMEM, single step per batch tile.
        TILE_H = Hpad
        h_tiles = 1
    else:
        # Large-H path: stream 512-wide W2 column tiles (Hpad padded to 512).
        Hpad = _round_up(Hpad, 512)
        TILE_H = 512
        h_tiles = Hpad // TILE_H

    # --- Host-side prep -----------------------------------------------------------
    freqs = jnp.exp(
        -math.log(max_period) * jnp.arange(half, dtype=jnp.float32) / half
    ).reshape(1, half)

    t2d = _pad2d(t.astype(jnp.float32).reshape(N, 1), (Npad, 1), jnp.float32)
    # bf16 weights (MXU-native, halves HBM weight traffic); biases stay f32 and are
    # added to the f32 accumulators. Zero padding keeps padded rows/cols inert
    # (SiLU(0) = 0, zero W2 rows contribute nothing).
    w1_p = _pad2d(w1, (F, Hpad), jnp.bfloat16)
    b1_p = _pad2d(b1.reshape(1, H), (1, Hpad), jnp.float32)
    w2_p = _pad2d(w2, (Hpad, Hpad), jnp.bfloat16)
    b2_p = _pad2d(b2.reshape(1, H), (1, Hpad), jnp.float32)

    out_bytes_per_elem = jnp.dtype(out_dtype).itemsize
    # W2 is re-streamed per batch tile only when it is tiled (inner axis cycles).
    w2_stream_factor = n_tiles if h_tiles > 1 else 1
    cost = pl.CostEstimate(
        flops=2 * Npad * (F * Hpad + Hpad * Hpad),
        transcendentals=Npad * (F + Hpad),               # sin+cos + sigmoid
        bytes_accessed=(t2d.size * 4 + freqs.size * 4
                        + w1_p.size * 2 + b1_p.size * 4
                        + (w2_p.size * 2 + b2_p.size * 4) * w2_stream_factor
                        + Npad * Hpad * out_bytes_per_elem),
    )

    # --- BlockSpecs ----------------------------------------------------------------
    if h_tiles > 1:
        # Deeper buffering keeps the W2 DMA stream continuous across grid steps.
        w2_spec = pl.BlockSpec((Hpad, TILE_H), lambda i, j: (0, j),
                               pipeline_mode=pl.Buffered(3))
        b2_spec = pl.BlockSpec((1, TILE_H), lambda i, j: (0, j),
                               pipeline_mode=pl.Buffered(3))
    else:
        w2_spec = pl.BlockSpec((Hpad, TILE_H), lambda i, j: (0, 0))   # resident
        b2_spec = pl.BlockSpec((1, TILE_H), lambda i, j: (0, 0))

    grid_spec = pltpu.PrefetchScalarGridSpec(
        num_scalar_prefetch=0,
        # Batch-tile axis outer (parallel / megacore-shardable), W2-column axis inner
        # ("arbitrary": the h scratch is reused across it).
        grid=(n_tiles, h_tiles),
        in_specs=[
            pl.BlockSpec((TN, 1), lambda i, j: (i, 0)),        # t (batch tile)
            pl.BlockSpec((1, half), lambda i, j: (0, 0)),      # freqs   (resident)
            pl.BlockSpec((F, Hpad), lambda i, j: (0, 0)),      # W1      (resident)
            pl.BlockSpec((1, Hpad), lambda i, j: (0, 0)),      # b1      (resident)
            w2_spec,                                           # W2 (resident or tiled)
            b2_spec,                                           # b2
        ],
        out_specs=pl.BlockSpec((TN, TILE_H), lambda i, j: (i, j)),
        scratch_shapes=[pltpu.VMEM((TN, Hpad), jnp.float32)],  # h cache
    )

    out = pl.pallas_call(
        _timestep_embedder_kernel,
        out_shape=jax.ShapeDtypeStruct((Npad, Hpad), out_dtype),
        grid_spec=grid_spec,
        compiler_params=pltpu.CompilerParams(
            dimension_semantics=("parallel", "arbitrary"),
            vmem_limit_bytes=vmem_limit,
        ),
        cost_estimate=cost,
    )(t2d, freqs, w1_p, b1_p, w2_p, b2_p)

    # TODO(synk): cross-call weight residency / fusion with adjacent adaLN matmuls is
    # a call-site-level optimization and is out of scope for this kernel.
    return out[:N, :H]


def _reference(t, params, frequency_embedding_size=256, max_period=10000):
    """Pure-JAX f32 reference matching the PyTorch forward exactly."""
    F = frequency_embedding_size
    half = F // 2
    freqs = jnp.exp(-math.log(max_period) * jnp.arange(half, dtype=jnp.float32) / half)
    args = t.astype(jnp.float32)[:, None] * freqs[None]
    emb = jnp.concatenate([jnp.cos(args), jnp.sin(args)], axis=-1)
    h = emb @ params["w1"] + params["b1"]
    h = h * jax.nn.sigmoid(h)
    return h @ params["w2"] + params["b2"]


def _reference_bf16(t, params, frequency_embedding_size=256, max_period=10000):
    """Reference at the kernel's precision: bf16 matmul inputs, f32 accumulation."""
    F = frequency_embedding_size
    half = F // 2
    freqs = jnp.exp(-math.log(max_period) * jnp.arange(half, dtype=jnp.float32) / half)
    args = t.astype(jnp.float32)[:, None] * freqs[None]
    emb = jnp.concatenate([jnp.cos(args), jnp.sin(args)], axis=-1).astype(jnp.bfloat16)
    h = jnp.dot(emb, params["w1"].astype(jnp.bfloat16),
                preferred_element_type=jnp.float32) + params["b1"]
    h = h * jax.nn.sigmoid(h)
    return jnp.dot(h.astype(jnp.bfloat16), params["w2"].astype(jnp.bfloat16),
                   preferred_element_type=jnp.float32) + params["b2"]


def init_params(key, hidden_size, frequency_embedding_size=256):
    k1, k2, k3, k4 = jax.random.split(key, 4)
    F, H = frequency_embedding_size, hidden_size
    # Deterministic synthetic init (scaled normal); weights stored as (in, out).
    return {
        "w1": jax.random.normal(k1, (F, H), jnp.float32) * (1.0 / math.sqrt(F)),
        "b1": jax.random.normal(k2, (H,), jnp.float32) * 0.01,
        "w2": jax.random.normal(k3, (H, H), jnp.float32) * (1.0 / math.sqrt(H)),
        "b2": jax.random.normal(k4, (H,), jnp.float32) * 0.01,
    }


if __name__ == "__main__":
    key = jax.random.PRNGKey(0)
    kp, kt = jax.random.split(key)

    hidden_size = 32
    freq_size = 256
    N = 8  # batch of scalar timesteps

    params = init_params(kp, hidden_size, freq_size)
    t = jax.random.uniform(kt, (N,), jnp.float32, minval=0.0, maxval=1000.0)

    out = timestep_embedder(t, params, frequency_embedding_size=freq_size)
    out = jax.block_until_ready(out)

    assert out.shape == (N, hidden_size)

    ref_bf16 = _reference_bf16(t, params, frequency_embedding_size=freq_size)
    ref_f32 = _reference(t, params, frequency_embedding_size=freq_size)
    # Tight check against a same-precision (bf16 matmul inputs) reference ...
    assert jnp.allclose(out, ref_bf16, atol=1e-2, rtol=1e-2), "mismatch vs bf16 reference"
    # ... and a looser sanity check against the exact f32 PyTorch-equivalent math.
    assert jnp.allclose(out, ref_f32, atol=6e-2, rtol=6e-2), "mismatch vs f32 reference"

    print("KERNEL_OK")
</pallas_src>

<mosaic_0001>
module attributes {stable_mosaic.version = 11 : i64} {
  func.func @_timestep_embedder_kernel(%arg0: i32, %arg1: i32, %arg2: memref<16x1xf32, #tpu.memory_space<vmem>>, %arg3: memref<1x128xf32, #tpu.memory_space<vmem>>, %arg4: memref<256x128xbf16, #tpu.memory_space<vmem>>, %arg5: memref<1x128xf32, #tpu.memory_space<vmem>>, %arg6: memref<128x128xbf16, #tpu.memory_space<vmem>>, %arg7: memref<1x128xf32, #tpu.memory_space<vmem>>, %arg8: memref<16x128xf32, #tpu.memory_space<vmem>>, %arg9: memref<16x128xf32, #tpu.memory_space<vmem>>) attributes {dimension_semantics = [#tpu.dimension_semantics<parallel>, #tpu.dimension_semantics<arbitrary>], iteration_bounds = array<i64: 1, 1>, scalar_prefetch = 0 : i64, scratch_operands = 1 : i64, tpu.core_type = #tpu.core_type<tc>, window_params = [{transform_indices = @transform_0, window_bounds = array<i64: 16, 1>}, {pipeline_mode = #tpu.pipeline_mode<synchronous>, transform_indices = @transform_1, window_bounds = array<i64: 1, 128>}, {pipeline_mode = #tpu.pipeline_mode<synchronous>, transform_indices = @transform_2, window_bounds = array<i64: 256, 128>}, {pipeline_mode = #tpu.pipeline_mode<synchronous>, transform_indices = @transform_3, window_bounds = array<i64: 1, 128>}, {pipeline_mode = #tpu.pipeline_mode<synchronous>, transform_indices = @transform_4, window_bounds = array<i64: 128, 128>}, {pipeline_mode = #tpu.pipeline_mode<synchronous>, transform_indices = @transform_5, window_bounds = array<i64: 1, 128>}, {transform_indices = @transform_6, window_bounds = array<i64: 16, 128>}]} {
    %c0_i32 = arith.constant 0 : i32
    %0 = arith.cmpi eq, %arg1, %c0_i32 : i32
    %1 = arith.extui %0 : i1 to i32
    %c0_i32_0 = arith.constant 0 : i32
    %2 = arith.cmpi ne, %1, %c0_i32_0 : i32
    scf.if %2 {
      %c0_8 = arith.constant 0 : index
      %c0_9 = arith.constant 0 : index
      %11 = vector.load %arg2[%c0_8, %c0_9] : memref<16x1xf32, #tpu.memory_space<vmem>>, vector<16x1xf32>
      %c0_10 = arith.constant 0 : index
      %c0_11 = arith.constant 0 : index
      %12 = vector.load %arg3[%c0_10, %c0_11] : memref<1x128xf32, #tpu.memory_space<vmem>>, vector<1x128xf32>
      %13 = vector.broadcast %11 : vector<16x1xf32> to vector<16x128xf32>
      %14 = vector.broadcast %12 : vector<1x128xf32> to vector<16x128xf32>
      %15 = arith.mulf %13, %14 : vector<16x128xf32>
      %16 = math.cos %15 : vector<16x128xf32>
      %17 = math.sin %15 : vector<16x128xf32>
      %18 = tpu.concatenate %16, %17 in 1 : vector<16x128xf32>, vector<16x128xf32> -> vector<16x256xf32>
      %19 = arith.truncf %18 : vector<16x256xf32> to vector<16x256xbf16>
      %c0_12 = arith.constant 0 : index
      %c0_13 = arith.constant 0 : index
      %20 = vector.load %arg4[%c0_12, %c0_13] : memref<256x128xbf16, #tpu.memory_space<vmem>>, vector<256x128xbf16>
      %cst_14 = arith.constant dense<0.000000e+00> : vector<16x128xf32>
      %21 = tpu.matmul %19, %20, %cst_14 {dimension_numbers = #tpu.dot_dimension_numbers<[1], [0], [0], [1], [0, 0, 1, 1], [], []>} : vector<16x256xbf16>, vector<256x128xbf16>, vector<16x128xf32> -> vector<16x128xf32>
      %c0_15 = arith.constant 0 : index
      %c0_16 = arith.constant 0 : index
      %22 = vector.load %arg5[%c0_15, %c0_16] : memref<1x128xf32, #tpu.memory_space<vmem>>, vector<1x128xf32>
      %23 = vector.broadcast %22 : vector<1x128xf32> to vector<16x128xf32>
      %24 = arith.addf %21, %23 : vector<16x128xf32>
      %25 = arith.negf %24 : vector<16x128xf32>
      %26 = math.exp %25 : vector<16x128xf32>
      %cst_17 = arith.constant 1.000000e+00 : f32
      %27 = vector.broadcast %cst_17 : f32 to vector<16x128xf32>
      %28 = arith.addf %27, %26 : vector<16x128xf32>
      %29 = arith.divf %27, %28 : vector<16x128xf32>
      %30 = arith.mulf %24, %29 : vector<16x128xf32>
      %c0_18 = arith.constant 0 : index
      %c0_19 = arith.constant 0 : index
      %31 = vector.load %arg9[%c0_18, %c0_19] : memref<16x128xf32, #tpu.memory_space<vmem>>, vector<16x128xf32>
      tpu.vector_store %arg9[%c0_18, %c0_19], %30 {strides = array<i32>} : memref<16x128xf32, #tpu.memory_space<vmem>>, vector<16x128xf32>,
    } else {
    }
    %c0 = arith.constant 0 : index
    %c0_1 = arith.constant 0 : index
    %3 = vector.load %arg9[%c0, %c0_1] : memref<16x128xf32, #tpu.memory_space<vmem>>, vector<16x128xf32>
    %4 = arith.truncf %3 : vector<16x128xf32> to vector<16x128xbf16>
    %c0_2 = arith.constant 0 : index
    %c0_3 = arith.constant 0 : index
    %5 = vector.load %arg6[%c0_2, %c0_3] : memref<128x128xbf16, #tpu.memory_space<vmem>>, vector<128x128xbf16>
    %cst = arith.constant dense<0.000000e+00> : vector<16x128xf32>
    %6 = tpu.matmul %4, %5, %cst {dimension_numbers = #tpu.dot_dimension_numbers<[1], [0], [0], [1], [0, 0, 1, 1], [], []>} : vector<16x128xbf16>, vector<128x128xbf16>, vector<16x128xf32> -> vector<16x128xf32>
    %c0_4 = arith.constant 0 : index
    %c0_5 = arith.constant 0 : index
    %7 = vector.load %arg7[%c0_4, %c0_5] : memref<1x128xf32, #tpu.memory_space<vmem>>, vector<1x128xf32>
    %8 = vector.broadcast %7 : vector<1x128xf32> to vector<16x128xf32>
    %9 = arith.addf %6, %8 : vector<16x128xf32>
    %c0_6 = arith.constant 0 : index
    %c0_7 = arith.constant 0 : index
    %10 = vector.load %arg8[%c0_6, %c0_7] : memref<16x128xf32, #tpu.memory_space<vmem>>, vector<16x128xf32>
    tpu.vector_store %arg8[%c0_6, %c0_7], %9 {strides = array<i32>} : memref<16x128xf32, #tpu.memory_space<vmem>>, vector<16x128xf32>,
    return
  }
  func.func @transform_0(%arg0: i32, %arg1: i32) -> (i32, i32) {
    %c0_i32 = arith.constant 0 : i32
    %c0_i32_0 = arith.constant 0 : i32
    return %arg0, %c0_i32 : i32, i32
  }
  func.func @transform_1(%arg0: i32, %arg1: i32) -> (i32, i32) {
    %c0_i32 = arith.constant 0 : i32
    %c0_i32_0 = arith.constant 0 : i32
    %c0_i32_1 = arith.constant 0 : i32
    return %c0_i32, %c0_i32_0 : i32, i32
  }
  func.func @transform_2(%arg0: i32, %arg1: i32) -> (i32, i32) {
    %c0_i32 = arith.constant 0 : i32
    %c0_i32_0 = arith.constant 0 : i32
    %c0_i32_1 = arith.constant 0 : i32
    return %c0_i32, %c0_i32_0 : i32, i32
  }
  func.func @transform_3(%arg0: i32, %arg1: i32) -> (i32, i32) {
    %c0_i32 = arith.constant 0 : i32
    %c0_i32_0 = arith.constant 0 : i32
    %c0_i32_1 = arith.constant 0 : i32
    return %c0_i32, %c0_i32_0 : i32, i32
  }
  func.func @transform_4(%arg0: i32, %arg1: i32) -> (i32, i32) {
    %c0_i32 = arith.constant 0 : i32
    %c0_i32_0 = arith.constant 0 : i32
    %c0_i32_1 = arith.constant 0 : i32
    return %c0_i32, %c0_i32_0 : i32, i32
  }
  func.func @transform_5(%arg0: i32, %arg1: i32) -> (i32, i32) {
    %c0_i32 = arith.constant 0 : i32
    %c0_i32_0 = arith.constant 0 : i32
    %c0_i32_1 = arith.constant 0 : i32
    return %c0_i32, %c0_i32_0 : i32, i32
  }
  func.func @transform_6(%arg0: i32, %arg1: i32) -> (i32, i32) {
    %c0_i32 = arith.constant 0 : i32
    return %arg0, %arg1 : i32, i32
  }
}

</mosaic_0001>

<bundles_post_ra>
// kernel: tpu_custom_call.1
= control target key start
LH: loop header
LB: loop body
LE: loop exit
PB: predicated region body
PF: predicated region fallthrough
CT: control target
= control target key end

     0   :  { %11 = vsyncpa [#allocation4], 0  ;;  %s1225_s0 = inlined_call_operand.vmem [shape: f32[16,1], index: 0, kind: input, shape index: {}]   ;;  %s1226_s1 = inlined_call_operand.vmem [shape: f32[1,128], index: 1, kind: input, shape index: {}]   ;;  %s1227_s2 = inlined_call_operand.hbm [shape: bf16[256,128], index: 2, kind: input, shape index: {}]   ;;  %s1228_s3 = inlined_call_operand.vmem [shape: f32[1,128], index: 3, kind: input, shape index: {}]   ;;  %s1229_s4 = inlined_call_operand.hbm [shape: bf16[128,128], index: 4, kind: input, shape index: {}]   ;;  %s1230_s5 = inlined_call_operand.vmem [shape: f32[1,128], index: 5, kind: input, shape index: {}]   ;;  %s1231_s6 = inlined_call_operand.hbm [shape: f32[16,128], index: 6, kind: output, shape index: {}]  }
   0x1   :  { %12 = vsyncpa [#allocation7], 0 }
   0x2   :  { %13 = vsyncpa [#allocation5], 0  ;;  %s1054_s21 = smov [#allocation3]   ;;  %s982_s25 = scalar_lea.hbm %s1227_s2, 2048 }
   0x3   :  { %s23_s22 = sshll.u32 %s1054_s21, 4  ;;  %p983_p0 = scmp.ne.s32.totalorder %s1227_s2, %s982_s25  ;;  %s24_s22 = int_to_ptr.vmem [resolvable:$true] %s23_s22 }
   0x4   :  { %p986_p1 = scmp.lt.u32.totalorder %s982_s25, %s1227_s2 }
   0x6   :  { %p988_p2 = pnand %p986_p1, %p983_p0 }
   0x8   :  { %991 = shalt.err (!%p988_p2)
}
   0x9   :  { %s992_s30 = scalar_lea.vmem %s24_s22, 2048  ;;  %p997_p4 = scmp.lt.s32.totalorder %s24_s22, %s24_s22 }
   0xa   :  { %p993_p3 = scmp.ne.s32.totalorder %s24_s22, %s992_s30  ;;  %p998_p5 = scmp.lt.s32.totalorder %s992_s30, %s992_s30 }
   0xc   :  { %p999_p6 = por %p998_p5, %p997_p4 }
   0xe   :  { %p1000_p7 = pnand %p999_p6, %p993_p3 }
  0x10   :  { %1003 = shalt.err (!%p1000_p7)
}
  0x11   :  { %s1055_s7 = smov 64   ;;  %s1056_s8 = smov 4  }
  0x12   :  { %29 = dma.hbm_to_vmem [thread:$0]  %s1227_s2, 2048, %s24_s22, [#allocation4], %s1055_s7, %s1055_s7, %s1056_s8  }
  0x13   :  { %s1057_s11 = smov [#allocation6]   ;;  %s1004_s15 = scalar_lea.hbm %s1229_s4, 1024 }
  0x14   :  { %s37_s12 = sshll.u32 %s1057_s11, 4  ;;  %p1005_p8 = scmp.ne.s32.totalorder %s1229_s4, %s1004_s15  ;;  %s38_s12 = int_to_ptr.vmem [resolvable:$true] %s37_s12 }
  0x15   :  { %p1008_p9 = scmp.lt.u32.totalorder %s1004_s15, %s1229_s4 }
  0x17   :  { %p1010_p10 = pnand %p1008_p9, %p1005_p8 }
  0x19   :  { %1013 = shalt.err (!%p1010_p10)
}
  0x1a   :  { %s1014_s20 = scalar_lea.vmem %s38_s12, 1024  ;;  %p1019_p12 = scmp.lt.s32.totalorder %s38_s12, %s38_s12 }
  0x1b   :  { %p1015_p11 = scmp.ne.s32.totalorder %s38_s12, %s1014_s20  ;;  %p1020_p13 = scmp.lt.s32.totalorder %s1014_s20, %s1014_s20 }
  0x1d   :  { %p1021_p0 = por %p1020_p13, %p1019_p12 }
  0x1f   :  { %p1022_p1 = pnand %p1021_p0, %p1015_p11 }
  0x21   :  { %1025 = shalt.err (!%p1022_p1)
}
  0x22   :  { %43 = dma.hbm_to_vmem [thread:$0]  %s1229_s4, 1024, %s38_s12, [#allocation7], %s1055_s7, %s1055_s7, %s1056_s8  }
  0x23   :  { %1048 = dma.done.wait [#allocation4], 2048  }
  0x24   :  { %1049 = vsyncadd [#allocation4], 4294965248 }
  0x25   :  { %1050 = dma.done.wait [#allocation7], 1024  }
  0x26   :  { %1051 = vsyncadd [#allocation7], 4294966272  ;;  %v1058_v0 = vmov 0   ;;  %v57_v1 = vld [vmem:[%s1225_s0] sm:$0xff]  ;;  %v58_v2 = vld [vmem:[%s1225_s0 + $0x8] sm:$0xff]  ;;  %s1067_s28 = smov [#allocation8]  }
  0x27   :  { %941 = vset.pattern.permute.xlu0 %v1058_v0  ;;  %v942_v3 = vld [vmem:[#allocation3 + $0x40] sm:$0xff]   ;;  %v944_v5 = vld [vmem:[#allocation3 + $0x48] sm:$0xff]   ;;  %v946_v7 = vld [vmem:[#allocation3 + $0x50] sm:$0xff]   ;;  %v1059_v40 = vmov 683565275   ;;  %s808_s29 = sshll.u32 %s1067_s28, 4  ;;  %s809_s29 = int_to_ptr.vmem [resolvable:$true] %s808_s29 }
  0x28   :  { %62 = vperm.xlu0 %941, %v57_v1   ;;  %v943_v4 = vld [vmem:[#allocation3] sm:$0xff]   ;;  %866 = vmatprep.subr.bf16.mxu0 %v942_v3  ;;  %v945_v6 = vld [vmem:[#allocation3 + $0x8] sm:$0xff]   ;;  %v947_v8 = vld [vmem:[#allocation3 + $0x10] sm:$0xff]   ;;  %v1060_v44 = vmov 2475754826   ;;  %s1026_s30 = scalar_lea.vmem %s809_s29, 256  ;;  %p1031_p3 = scmp.lt.s32.totalorder %s809_s29, %s809_s29 }
  0x29   :  { %867 = vmatpush3.bf16.msra.mxu0 %v943_v4  ;;  %v948_v9 = vld [vmem:[#allocation3 + $0x58] sm:$0xff]   ;;  %v950_v11 = vld [vmem:[#allocation3 + $0x60] sm:$0xff]   ;;  %v952_v13 = vld [vmem:[#allocation3 + $0x68] sm:$0xff]   ;;  %v1061_v46 = vmov 2131351028   ;;  %p1027_p2 = scmp.ne.s32.totalorder %s809_s29, %s1026_s30  ;;  %p1032_p4 = scmp.lt.s32.totalorder %s1026_s30, %s1026_s30 }
  0x2a   :  { %868 = vmatprep.subr.bf16.mxu0 %v944_v5  ;;  %v949_v10 = vld [vmem:[#allocation3 + $0x18] sm:$0xff]   ;;  %v951_v12 = vld [vmem:[#allocation3 + $0x20] sm:$0xff]   ;;  %v953_v14 = vld [vmem:[#allocation3 + $0x28] sm:$0xff]   ;;  %v1062_v48 = vmov 2102212464  }
  0x2b   :  { %v954_v15 = vld [vmem:[#allocation3 + $0x70] sm:$0xff]   ;;  %v956_v17 = vld [vmem:[#allocation3 + $0x78] sm:$0xff]   ;;  %v821_v19 = vld [vmem:[%s1226_s1] ss:$0 sm:$0xff]  ;;  %v1063_v50 = vmov 920167782   ;;  %p1033_p5 = por %p1032_p4, %p1031_p3 }
  0x2c   :  { %67 = vperm.xlu0 %941, %v58_v2   ;;  %v955_v16 = vld [vmem:[#allocation3 + $0x30] sm:$0xff]   ;;  %v957_v18 = vld [vmem:[#allocation3 + $0x38] sm:$0xff]   ;;  %v1064_v57 = vmov 1326507024  }
  0x2d   :  { %869 = vmatpush3.bf16.msra.mxu0 %v945_v6  ;;  %p1034_p6 = pnand %p1033_p5, %p1027_p2 }
  0x2e   :  { %870 = vmatprep.subr.bf16.mxu0 %v946_v7 }
  0x31   :  { %871 = vmatpush3.bf16.msra.mxu0 %v947_v8 }
  0x32   :  { %872 = vmatprep.subr.bf16.mxu0 %v948_v9 }
  0x35   :  { %873 = vmatpush3.bf16.msra.mxu0 %v949_v10 }
  0x36   :  { %874 = vmatprep.subr.bf16.mxu0 %v950_v11 }
  0x39   :  { %875 = vmatpush3.bf16.msra.mxu0 %v951_v12 }
  0x3a   :  { %876 = vmatprep.subr.bf16.mxu0 %v952_v13 }
  0x3d   :  { %877 = vmatpush3.bf16.msra.mxu0 %v953_v14 }
  0x3e   :  { %878 = vmatprep.subr.bf16.mxu0 %v954_v15 }
  0x41   :  { %879 = vmatpush3.bf16.msra.mxu0 %v955_v16 }
  0x42   :  { %880 = vmatprep.subr.bf16.mxu0 %v956_v17 }
  0x45   :  { %881 = vmatpush3.bf16.msra.mxu0 %v957_v18 }
  0xa7   :  { %v63_v20 = vpop.permute.xlu0 %62 }
  0xa8   :  { %v1138_v21 = vmul.f32 %v821_v19, %v63_v20 }
  0xaa   :  { %v78_v22 = vand.u32 2147483647, %v1138_v21  ;;  %v81_v23 = vand.u32 2139095040, %v1138_v21  ;;  %vm80_vm14 = vcmp.lt.s32.totalorder %v1138_v21, 0 }
  0xab   :  { %v68_v24 = vpop.permute.xlu0 %67 }
  0xac   :  { %v82_v25 = vshrl.u32 %v81_v23, 23  ;;  %v1142_v26 = vmul.f32 %v821_v19, %v68_v24  ;;  %v85_v27 = vand.u32 8388607, %v78_v22  ;;  %vm79_vm15 = vcmp.le.f32.partialorder %v78_v22, 0.7853982 }
  0xae   :  { %v822_v28 = vadd.s32 4294967169, %v82_v25  ;;  %v184_v29 = vand.u32 2139095040, %v1142_v26  ;;  %v86_v31 = vor.u32 8388608, %v85_v27  ;;  %v181_v33 = vand.u32 2147483647, %v1142_v26 }
  0xb0   :  { %v88_v30 = vadd.s32 1, %v822_v28  ;;  %v185_v32 = vshrl.u32 %v184_v29, 23  ;;  %v1148_v38 = vshll.u32 %v86_v31, 8  ;;  %v188_v42 = vand.u32 8388607, %v181_v33 }
  0xb2   :  { %vm89_vm0 = vcmp.gt.s32.totalorder %v88_v30, 0  ;;  %v826_v35 = vadd.s32 4294967169, %v185_v32  ;;  %v189_v8 = vor.u32 8388608, %v188_v42 }
  0xb3   :  { %v90_v34 = vsel %vm89_vm0, %v88_v30, 0  ;;  %vm183_vm0 = vcmp.lt.s32.totalorder %v1142_v26, 0 }
  0xb4   :  { %v91_v36 = vshrl.u32 %v90_v34, 5  ;;  %v92_v37 = vand.u32 31, %v90_v34  ;;  %v191_v43 = vadd.s32 1, %v826_v35  ;;  %v229_v23 = vshll.u32 %v189_v8, 8 }
  0xb6   :  { %v93_v39 = vsub.s32 32, %v92_v37  ;;  %v95_v41 = vshll.u32 %v1059_v40, %v92_v37  ;;  %v98_v45 = vshll.u32 %v1060_v44, %v92_v37  ;;  %v101_v47 = vshll.u32 %v1061_v46, %v92_v37 }
  0xb7   :  { %v104_v49 = vshll.u32 %v1062_v48, %v92_v37  ;;  %v107_v51 = vshll.u32 %v1063_v50, %v92_v37  ;;  %vm110_vm1 = vcmp.lt.s32.totalorder %v91_v36, 1  ;;  %vm112_vm2 = vcmp.lt.s32.totalorder %v91_v36, 3 }
  0xb8   :  { %v96_v52 = vshrl.u32 %v1060_v44, %v93_v39  ;;  %v99_v53 = vshrl.u32 %v1061_v46, %v93_v39  ;;  %v102_v54 = vshrl.u32 %v1062_v48, %v93_v39  ;;  %v94_v55 = vshrl.u32 %v1059_v40, %v93_v39 }
  0xb9   :  { %v105_v56 = vshrl.u32 %v1063_v50, %v93_v39  ;;  %v108_v58 = vshrl.u32 %v1064_v57, %v93_v39  ;;  %vm192_vm3 = vcmp.gt.s32.totalorder %v191_v43, 0  ;;  %vm113_vm4 = vcmp.lt.s32.totalorder %v91_v36, 4 }
  0xba   :  { %v97_v59 = vor.u32 %v96_v52, %v95_v41  ;;  %v100_v60 = vor.u32 %v99_v53, %v98_v45  ;;  %v103_v61 = vor.u32 %v102_v54, %v101_v47  ;;  %v193_v0 = vsel %vm192_vm3, %v191_v43, 0 }
  0xbb   :  { %v106_v62 = vor.u32 %v105_v56, %v104_v49  ;;  %v109_v63 = vor.u32 %v108_v58, %v107_v51  ;;  %vm111_vm5 = vcmp.lt.s32.totalorder %v91_v36, 2  ;;  %v195_v11 = vand.u32 31, %v193_v0 }
  0xbc   :  { %v114_v1 = vsel %vm110_vm1, %v94_v55, %v97_v59  ;;  %v115_v2 = vsel %vm113_vm4, %v103_v61, 2102212464  ;;  %v118_v3 = vsel %vm110_vm1, %v97_v59, %v100_v60  ;;  %v122_v4 = vsel %vm110_vm1, %v100_v60, %v103_v61 }
  0xbd   :  { %v116_v5 = vsel %vm112_vm2, %v100_v60, %v115_v2  ;;  %v119_v6 = vsel %vm113_vm4, %v106_v62, 920167782  ;;  %v123_v7 = vsel %vm113_vm4, %v109_v63, 1326507024  ;;  %v194_v19 = vshrl.u32 %v193_v0, 5 }
  0xbe   :  { %v120_v9 = vsel %vm112_vm2, %v103_v61, %v119_v6  ;;  %v124_v10 = vsel %vm112_vm2, %v106_v62, %v123_v7  ;;  %v117_v12 = vsel %vm111_vm5, %v114_v1, %v116_v5  ;;  %v196_v20 = vsub.s32 32, %v195_v11 }
  0xbf   :  { %v121_v13 = vsel %vm111_vm5, %v118_v3, %v120_v9  ;;  %v125_v14 = vsel %vm111_vm5, %v122_v4, %v124_v10  ;;  %v133_v24 = vmul.u32 %v1148_v38, %v117_v12  ;;  %v198_v25 = vshll.u32 %v1059_v40, %v195_v11 }
  0xc0   :  { %v1161_v15 = vmul.u32.u64.low %v1148_v38, %v125_v14  ;;  %v1162_v16 = vmul.u32.u64.high %v1148_v38, %v125_v14, %v1161_v15  ;;  %v1165_v17 = vmul.u32.u64.low %v1148_v38, %v121_v13  ;;  %v1166_v18 = vmul.u32.u64.high %v1148_v38, %v121_v13, %v1165_v17 }
  0xc1   :  { %v201_v27 = vshll.u32 %v1060_v44, %v195_v11  ;;  %v204_v28 = vshll.u32 %v1061_v46, %v195_v11  ;;  %v199_v29 = vshrl.u32 %v1060_v44, %v196_v20  ;;  %v202_v30 = vshrl.u32 %v1061_v46, %v196_v20 }
  0xc2   :  { %v205_v31 = vshrl.u32 %v1062_v48, %v196_v20  ;;  %v207_v32 = vshll.u32 %v1062_v48, %v195_v11  ;;  %vm135_vm6 = vc.u32 %v1162_v16, %v1165_v17  ;;  %v136_v34 = vadd.s32 1, %v1166_v18 }
  0xc3   :  { %v208_v35 = vshrl.u32 %v1063_v50, %v196_v20  ;;  %v210_v36 = vshll.u32 %v1063_v50, %v195_v11  ;;  %v200_v37 = vor.u32 %v199_v29, %v198_v25  ;;  %v203_v39 = vor.u32 %v202_v30, %v201_v27 }
  0xc4   :  { %v206_v41 = vor.u32 %v205_v31, %v204_v28  ;;  %v211_v42 = vshrl.u32 %v1064_v57, %v196_v20  ;;  %v137_v38 = vsel %vm135_vm6, %v136_v34, %v1166_v18  ;;  %vm213_vm7 = vcmp.lt.s32.totalorder %v194_v19, 1 }
  0xc5   :  { %v209_v43 = vor.u32 %v208_v35, %v207_v32  ;;  %vm216_vm8 = vcmp.lt.s32.totalorder %v194_v19, 4  ;;  %v138_v44 = vadd.s32 %v137_v38, %v133_v24  ;;  %vm215_vm9 = vcmp.lt.s32.totalorder %v194_v19, 3 }
  0xc6   :  { %v212_v45 = vor.u32 %v211_v42, %v210_v36  ;;  %v218_v46 = vsel %vm216_vm8, %v206_v41, 2102212464  ;;  %v197_v47 = vshrl.u32 %v1059_v40, %v196_v20  ;;  %v221_v48 = vsel %vm213_vm7, %v200_v37, %v203_v39 }
  0xc7   :  { %v222_v49 = vsel %vm216_vm8, %v209_v43, 920167782  ;;  %v225_v51 = vsel %vm213_vm7, %v203_v39, %v206_v41  ;;  %v139_v52 = vadd.s32 536870912, %v138_v44  ;;  %vm214_vm10 = vcmp.lt.s32.totalorder %v194_v19, 2 }
  0xc8   :  { %v223_v50 = vsel %vm215_vm9, %v206_v41, %v222_v49  ;;  %v226_v53 = vsel %vm216_vm8, %v212_v45, 1326507024  ;;  %v217_v54 = vsel %vm213_vm7, %v197_v47, %v200_v37  ;;  %v219_v55 = vsel %vm215_vm9, %v203_v39, %v218_v46 }
  0xc9   :  { %v224_v56 = vsel %vm214_vm10, %v221_v48, %v223_v50  ;;  %v227_v57 = vsel %vm215_vm9, %v209_v43, %v226_v53  ;;  %v1176_v58 = vshrl.u32 %v139_v52, 30  ;;  %v220_v0 = vsel %vm214_vm10, %v217_v54, %v219_v55 }
  0xca   :  { %v228_v59 = vsel %vm214_vm10, %v225_v51, %v227_v57  ;;  %v1178_v60 = vmul.u32.u64.low %v229_v23, %v224_v56  ;;  %v1179_v61 = vmul.u32.u64.high %v229_v23, %v224_v56, %v1178_v60  ;;  %v236_v3 = vmul.u32 %v229_v23, %v220_v0 }
  0xcb   :  { %v1181_v62 = vmul.u32.u64.low %v229_v23, %v228_v59  ;;  %v1182_v63 = vmul.u32.u64.high %v229_v23, %v228_v59, %v1181_v62  ;;  %v141_v40 = vshll.u32 %v1176_v58, 30  ;;  %v134_v15 = vadd.s32 %v1165_v17, %v1162_v16 }
  0xcc   :  { %v239_v2 = vadd.s32 1, %v1179_v61  ;;  %v164_v49 = vsub.s32 4, %v1176_v58  ;;  %vm182_vm1 = vcmp.le.f32.partialorder %v181_v33, 0.7853982 }
  0xcd   :  { %v142_v1 = vsub.s32 %v138_v44, %v141_v40  ;;  %vm238_vm11 = vc.u32 %v1182_v63, %v1178_v60  ;;  %v237_v39 = vadd.s32 %v1178_v60, %v1182_v63 }
  0xce   :  { %v240_v5 = vsel %vm238_vm11, %v239_v2, %v1179_v61  ;;  %v165_v54 = vsel %vm80_vm14, %v164_v49, %v1176_v58 }
  0xcf   :  { %v144_v4 = vsub.s32 0, %v142_v1  ;;  %v241_v6 = vadd.s32 %v240_v5, %v236_v3  ;;  %v167_v22 = vsel %vm79_vm15, 0, %v165_v54 }
  0xd0   :  { %v377_v61 = vadd.s32 3, %v167_v22  ;;  %v171_v0 = vand.u32 3, %v167_v22 }
  0xd1   :  { %v823_v7 = vmin.u32 %v144_v4, %v142_v1  ;;  %v242_v8 = vadd.s32 536870912, %v241_v6 }
  0xd2   :  { %v378_v58 = vand.u32 3, %v377_v61  ;;  %vm173_vm2 = vcmp.eq.s32.totalorder %v171_v0, 0  ;;  %vm176_vm3 = vcmp.eq.s32.totalorder %v171_v0, 2  ;;  %vm172_vm6 = vcmp.lt.s32.totalorder %v171_v0, 2 }
  0xd3   :  { %v146_v9 = vclz %v823_v7  ;;  %v243_v10 = vshrl.u32 %v242_v8, 30 }
  0xd4   :  { %vm380_vm4 = vcmp.eq.s32.totalorder %v378_v58, 0  ;;  %vm383_vm5 = vcmp.eq.s32.totalorder %v378_v58, 2  ;;  %vm379_vm8 = vcmp.lt.s32.totalorder %v378_v58, 2 }
  0xd5   :  { %v824_v11 = vadd.s32 4294967294, %v146_v9  ;;  %v244_v12 = vshll.u32 %v243_v10, 30  ;;  %v267_v53 = vsub.s32 4, %v243_v10 }
  0xd7   :  { %vm825_vm12 = vcmp.lt.s32.totalorder %v824_v11, 0  ;;  %v245_v14 = vsub.s32 %v241_v6, %v244_v12  ;;  %v268_v57 = vsel %vm183_vm0, %v267_v53, %v243_v10 }
  0xd8   :  { %v149_v13 = vsel %vm825_vm12, 0, %v824_v11  ;;  %v270_v60 = vsel %vm182_vm1, 0, %v268_v57  ;;  %v857_v57 = vld [vmem:[%s1230_s5] ss:$0 sm:$0xff] }
  0xd9   :  { %v150_v18 = vsub.s32 32, %v149_v13  ;;  %v154_v19 = vsub.s32 4294967266, %v149_v13  ;;  %v247_v20 = vsub.s32 0, %v245_v14  ;;  %v151_v23 = vshll.u32 %v142_v1, %v149_v13 }
  0xda   :  { %v481_v40 = vadd.s32 3, %v270_v60  ;;  %v274_v3 = vand.u32 3, %v270_v60 }
  0xdb   :  { %v152_v24 = vshrl.u32 %v134_v15, %v150_v18  ;;  %v155_v25 = vadd.s32 127, %v154_v19  ;;  %v827_v27 = vmin.u32 %v247_v20, %v245_v14 }
  0xdc   :  { %v482_v4 = vand.u32 3, %v481_v40  ;;  %vm276_vm7 = vcmp.eq.s32.totalorder %v274_v3, 0  ;;  %vm279_vm9 = vcmp.eq.s32.totalorder %v274_v3, 2  ;;  %vm275_vm12 = vcmp.lt.s32.totalorder %v274_v3, 2 }
  0xdd   :  { %v153_v28 = vor.u32 %v152_v24, %v151_v23  ;;  %v156_v29 = vshll.u32 %v155_v25, 23  ;;  %v249_v30 = vclz %v827_v27 }
  0xde   :  { %vm484_vm10 = vcmp.eq.s32.totalorder %v482_v4, 0  ;;  %vm487_vm11 = vcmp.eq.s32.totalorder %v482_v4, 2 }
  0xdf   :  { %v157_v31 = vor.u32 4788187, %v156_v29  ;;  %v828_v32 = vadd.s32 4294967294, %v249_v30  ;;  %v160_v35 = vcvt.s32.f32 %v153_v28 }
  0xe1   :  { %v158_v34 = vand.u32 2147483647, %v157_v31  ;;  %vm829_vm13 = vcmp.lt.s32.totalorder %v828_v32, 0  ;;  %v958_v31 = vld [vmem:[#allocation6] sm:$0xff]  }
  0xe2   :  { %v252_v37 = vsel %vm829_vm13, 0, %v828_v32  ;;  %vm483_vm13 = vcmp.lt.s32.totalorder %v482_v4, 2  ;;  %v1065_v32 = vmov 0.0  }
  0xe3   :  { %v161_v36 = vmul.f32 %v160_v35, %v158_v34  ;;  %v253_v16 = vsub.s32 32, %v252_v37  ;;  %v257_v17 = vsub.s32 4294967266, %v252_v37  ;;  %v254_v42 = vshll.u32 %v245_v14, %v252_v37  ;;  %897 = vmatprep.subr.bf16.mxu1 %v1065_v32  ;;  %v959_v34 = vld [vmem:[#allocation6 + $0x8] sm:$0xff]   ;;  %v962_v35 = vld [vmem:[#allocation6 + $0x20] sm:$0xff]   ;;  %v964_v37 = vld [vmem:[#allocation6 + $0x30] sm:$0xff]  }
  0xe4   :  { %898 = vmatpush3.bf16.msra.mxu1 %v958_v31 }
  0xe5   :  { %v162_v41 = vxor.u32 2147483648, %v161_v36  ;;  %v255_v38 = vshrl.u32 %v237_v39, %v253_v16  ;;  %v258_v43 = vadd.s32 127, %v257_v17  ;;  %899 = vmatprep.subr.bf16.mxu1 %v1065_v32  ;;  %v965_v39 = vld [vmem:[#allocation6 + $0x38] sm:$0xff]   ;;  %v838_v17 = vld [vmem:[%s1228_s3] ss:$0 sm:$0xff] }
  0xe7   :  { %v163_v44 = vsel %vm80_vm14, %v162_v41, %v161_v36  ;;  %v256_v45 = vor.u32 %v255_v38, %v254_v42  ;;  %v259_v46 = vshll.u32 %v258_v43, 23  ;;  %vm170_vm14 = vweird.f32 %v1138_v21  ;;  %v963_v36 = vld [vmem:[#allocation6 + $0x28] sm:$0xff]  }
  0xe8   :  { %v166_v47 = vsel %vm79_vm15, %v1138_v21, %v163_v44  ;;  %vm273_vm15 = vweird.f32 %v1142_v26  ;;  %900 = vmatpush3.bf16.msra.mxu1 %v959_v34  ;;  %v960_v21 = vld [vmem:[#allocation6 + $0x10] sm:$0xff]  }
  0xe9   :  { %v260_v48 = vor.u32 4788187, %v259_v46  ;;  %v263_v52 = vcvt.s32.f32 %v256_v45  ;;  %966 = vcosq.f32 %v166_v47  ;;  %901 = vmatprep.subr.bf16.mxu1 %v1065_v32 }
  0xea   :  { %968 = vsinq.f32 %v166_v47 }
  0xeb   :  { %v261_v51 = vand.u32 2147483647, %v260_v48 }
  0xec   :  { %902 = vmatpush3.bf16.msra.mxu1 %v960_v21 }
  0xed   :  { %v264_v50 = vmul.f32 %v263_v52, %v261_v51  ;;  %903 = vmatprep.subr.bf16.mxu1 %v1065_v32 }
  0xef   :  { %v265_v55 = vxor.u32 2147483648, %v264_v50 }
  0xf1   :  { %v266_v56 = vsel %vm183_vm0, %v265_v55, %v264_v50  ;;  %vm1066_vm0 = vmmov 0  }
  0xf2   :  { %v269_v59 = vsel %vm182_vm1, %v1142_v26, %v266_v56  ;;  %v961_v26 = vld [vmem:[#allocation6 + $0x18] sm:$0xff]   ;;  %913 = vmatprep.mubr.msk.bf16.mxu1 %vm1066_vm0, %v1065_v32 }
  0xf3   :  { %970 = vcosq.f32 %v269_v59  ;;  %v967_v62 = vpop.eup %966  ;;  %904 = vmatpush3.bf16.msra.mxu1 %v961_v26 }
  0xf4   :  { %972 = vsinq.f32 %v269_v59  ;;  %v969_v63 = vpop.eup %968  ;;  %v177_v2 = vxor.u32 2147483648, %v967_v62  ;;  %905 = vmatprep.subr.bf16.mxu1 %v1065_v32 }
  0xf5   :  { %v174_v1 = vxor.u32 2147483648, %v969_v63 }
  0xf6   :  { %v178_v6 = vsel %vm176_vm3, %v177_v2, %v969_v63  ;;  %v385_v8 = vsel %vm383_vm5, %v177_v2, %v969_v63 }
  0xf7   :  { %v175_v5 = vsel %vm173_vm2, %v967_v62, %v174_v1  ;;  %v382_v7 = vsel %vm380_vm4, %v967_v62, %v174_v1  ;;  %906 = vmatpush3.bf16.msra.mxu1 %v962_v35 }
  0xf8   :  { %v179_v12 = vsel %vm172_vm6, %v175_v5, %v178_v6  ;;  %v386_v14 = vsel %vm379_vm8, %v382_v7, %v385_v8  ;;  %907 = vmatprep.subr.bf16.mxu1 %v1065_v32 }
  0xf9   :  { %v180_v24 = vsel %vm170_vm14, nan, %v179_v12  ;;  %v387_v27 = vsel %vm170_vm14, nan, %v386_v14 }
  0xfb   :  { %908 = vmatpush3.bf16.msra.mxu1 %v963_v36 }
  0xfc   :  { %909 = vmatprep.subr.bf16.mxu1 %v1065_v32 }
  0xfd   :  { %v971_v33 = vpop.eup %970 }
  0xfe   :  { %v973_v9 = vpop.eup %972  ;;  %v280_v10 = vxor.u32 2147483648, %v971_v33 }
  0xff   :  { %v277_v11 = vxor.u32 2147483648, %v973_v9  ;;  %910 = vmatpush3.bf16.msra.mxu1 %v964_v37 }
 0x100   :  { %v281_v13 = vsel %vm279_vm9, %v280_v10, %v973_v9  ;;  %v489_v15 = vsel %vm487_vm11, %v280_v10, %v973_v9  ;;  %911 = vmatprep.subr.bf16.mxu1 %v1065_v32 }
 0x101   :  { %v278_v18 = vsel %vm276_vm7, %v971_v33, %v277_v11  ;;  %v486_v19 = vsel %vm484_vm10, %v971_v33, %v277_v11 }
 0x102   :  { %v282_v20 = vsel %vm275_vm12, %v278_v18, %v281_v13  ;;  %v490_v23 = vsel %vm483_vm13, %v486_v19, %v489_v15 }
 0x103   :  { %v283_v25 = vsel %vm273_vm15, nan, %v282_v20  ;;  %v491_v28 = vsel %vm273_vm15, nan, %v490_v23  ;;  %912 = vmatpush3.bf16.msra.mxu1 %v965_v39 }
 0x104   :  { %v493_v29 = vpack.c.bf16 %v491_v28, %v387_v27  ;;  %v492_v30 = vpack.c.bf16 %v283_v25, %v180_v24 }
 0x106   :  { %661 = vmatprep.mubr.bf16.mxu0 %v493_v29 }
 0x107   :  { %662 = vmatmul.mubr.bf16.vlgmr.msra.gmra.mrb[0].mxu0 %v492_v30 }
 0x1da   :  { %v882_v16 = vpop.f32.mrb[0].mxu0 }
 0x1db   :  { %v883_v41 = vpop.f32.mrb[1].mxu0 }
 0x1dc   :  { %v884_v42 = vadd.f32 %v883_v41, %v882_v16  ;;  %v885_v38 = vpop.f32.mrb[2].mxu0 }
 0x1dd   :  { %v886_v43 = vpop.f32.mrb[3].mxu0 }
 0x1de   :  { %v664_v44 = vadd.f32 %v884_v42, %v838_v17  ;;  %v887_v45 = vadd.f32 %v886_v43, %v885_v38 }
 0x1e0   :  { %v855_v46 = vmul.f32 -1.442695, %v664_v44  ;;  %v667_v47 = vadd.f32 %v887_v45, %v838_v17 }
 0x1e2   :  { %974 = vpow2.f32 %v855_v46  ;;  %v856_v48 = vmul.f32 -1.442695, %v667_v47 }
 0x1e4   :  { %976 = vpow2.f32 %v856_v48 }
 0x1ec   :  { %v975_v49 = vpop.eup %974 }
 0x1ed   :  { %v676_v51 = vadd.f32 1.0, %v975_v49 }
 0x1ee   :  { %v977_v52 = vpop.eup %976 }
 0x1ef   :  { %978 = vrcp.f32 %v676_v51  ;;  %v677_v50 = vadd.f32 1.0, %v977_v52 }
 0x1f1   :  { %980 = vrcp.f32 %v677_v50 }
 0x1f9   :  { %v979_v53 = vpop.eup %978 }
 0x1fa   :  { %v682_v55 = vmul.f32 %v979_v53, %v664_v44 }
 0x1fb   :  { %v981_v54 = vpop.eup %980 }
 0x1fc   :  { %v683_v56 = vmul.f32 %v981_v54, %v667_v47 }
 0x1fe   :  { %v688_v22 = vpack.c.bf16 %v683_v56, %v682_v55 }
 0x200   :  { %914 = vmatmul.mubr.bf16.vlgmr.msra.gmra.mrb[0].mxu1 %v688_v22 }
 0x2d3   :  { %v794_v59 = vpop.f32.mrb[0].mxu1 }
 0x2d4   :  { %v795_v60 = vadd.f32 %v857_v57, %v794_v59  ;;  %v915_v61 = vpop.f32.mrb[1].mxu1 }
 0x2d5   :  { %v797_v62 = vpop.f32.mrb[2].mxu1 }
 0x2d6   :  { %801 = vst [vmem:[#allocation8] sm:$0xff] %v795_v60  ;;  %v798_v63 = vadd.f32 %v857_v57, %v797_v62  ;;  %v916_v40 = vpop.f32.mrb[3].mxu1 }
 0x2d8   :  { %802 = vst [vmem:[#allocation8 + $0x8] sm:$0xff] %v798_v63 }
 0x2d9   :  { %1037 = shalt.err (!%p1034_p6)
}
 0x2da   :  { %s1038_s8 = scalar_lea.hbm %s1231_s6, 256 }
 0x2db   :  { %p1039_p7 = scmp.ne.s32.totalorder %s1231_s6, %s1038_s8  ;;  %p1042_p8 = scmp.lt.u32.totalorder %s1038_s8, %s1231_s6 }
 0x2dd   :  { %p1044_p9 = pnand %p1042_p8, %p1039_p7 }
 0x2df   :  { %1047 = shalt.err (!%p1044_p9)
}
 0x2e0   :  { %s1068_s13 = smov 128   ;;  %s1069_s14 = smov 8  }
 0x2e1   :  { %814 = dma.vmem_to_hbm [thread:$0]  %s809_s29, 256, %s1231_s6, [#allocation5], %s1068_s13, %s1068_s13, %s1069_s14  }
 0x2e2   :  { %1052 = dma.done.wait [#allocation5], 256  }
 0x2e3   :  { %1053 = vsyncadd [#allocation5], 4294967040 }
 0x2e4   :  { %818 = vsyncpa [#allocation4], 1 }
 0x2e5   :  { %819 = vsyncpa [#allocation7], 1 }
 0x2e6   :  { %820 = vsyncpa [#allocation5], 1 }

</bundles_post_ra>
